<compile_context>
chip_gen: v6e
topology: v6e:2x2x1
jax: 0.10.0
libtpu: 0.0.40
codegen_flags: <defaults>
</compile_context>

<pallas_src>
from functools import partial

import jax
import jax.numpy as jnp
from jax.experimental import pallas as pl
from jax.experimental.pallas import tpu as pltpu


def _round_up(x, m):
    return ((x + m - 1) // m) * m


def _softmax_ranking_loss_kernel(x_ref, t_ref, o_ref, acc_ref, *, inv_count):
    # x_ref, t_ref: (1, C, T) VMEM tiles (C on sublanes, T lane-dense)
    # o_ref:        (1, 1) SMEM scalar output
    # acc_ref:      (1, T) VMEM f32 running per-lane sum
    b = pl.program_id(0)
    s = pl.program_id(1)

    @pl.when((b == 0) & (s == 0))
    def _():
        acc_ref[...] = jnp.zeros_like(acc_ref)

    x = x_ref[0].astype(jnp.float32)                    # (C, T)
    t = t_ref[0].astype(jnp.float32)                    # (C, T)

    # Numerically-stable log-softmax over the class axis (axis 0).
    m = jnp.max(x, axis=0, keepdims=True)               # (1, T)
    xs = x - m
    e = jnp.exp(xs)                                     # one EUP exp / element
    denom = jnp.sum(e, axis=0, keepdims=True)           # (1, T)
    logp = xs - jnp.log(denom)                          # (C, T), LSE form

    # Per-lane partial of -sum_c(logp * t); accumulate across the whole grid.
    acc_ref[...] += -jnp.sum(logp * t, axis=0, keepdims=True)

    @pl.when((b == pl.num_programs(0) - 1) & (s == pl.num_programs(1) - 1))
    def _():
        o_ref[0, 0] = jnp.sum(acc_ref[...]) * inv_count


def softmax_ranking_loss(inputs, targets):
    assert inputs.shape == targets.shape
    assert inputs.ndim >= 2, "softmax over dim=1 requires ndim >= 2"
    B, C = inputs.shape[0], inputs.shape[1]
    S = 1
    for d in inputs.shape[2:]:
        S *= d
    S = max(S, 1)

    # NCHW-native: free reshape, class axis stays at dim 1 (sublanes in-kernel).
    x = inputs.reshape(B, C, S)
    t = targets.reshape(B, C, S)

    LANE = 128
    # Pick spatial tile T: big enough to amortize the ~0.35us per-step overhead,
    # small enough that double-buffered (C, T) f32 blocks stay well under the
    # scoped-VMEM budget on every generation (v7x: 64 MiB phys / 32 MiB default).
    max_block_bytes = 1 * 1024 * 1024
    t_cap = max(LANE, (max_block_bytes // (4 * max(C, 8))) // LANE * LANE)
    T = min(t_cap, _round_up(S, LANE))
    S_pad = _round_up(S, T)
    if S_pad != S:
        pad = S_pad - S
        # Padded columns contribute exactly 0: targets are zero there and the
        # zero logits still give a finite log-softmax.
        x = jnp.pad(x, ((0, 0), (0, 0), (0, pad)))
        t = jnp.pad(t, ((0, 0), (0, 0), (0, pad)))

    grid = (B, S_pad // T)
    inv_count = 1.0 / float(B * S)   # mean over every dim except the class dim

    kernel = partial(_softmax_ranking_loss_kernel, inv_count=inv_count)
    out = pl.pallas_call(
        kernel,
        out_shape=jax.ShapeDtypeStruct((1, 1), jnp.float32),
        grid_spec=pltpu.PrefetchScalarGridSpec(
            num_scalar_prefetch=0,
            grid=grid,
            in_specs=[
                pl.BlockSpec((1, C, T), lambda b, s: (b, 0, s)),
                pl.BlockSpec((1, C, T), lambda b, s: (b, 0, s)),
            ],
            out_specs=pl.BlockSpec((1, 1), lambda b, s: (0, 0),
                                   memory_space=pltpu.SMEM),
            scratch_shapes=[pltpu.VMEM((1, T), jnp.float32)],
        ),
        # Single scalar accumulator -> keep the grid sequential on one core.
        # TODO(synk): per-core partial sums + wrapper reduce to use both v7x TCs.
        compiler_params=pltpu.CompilerParams(
            dimension_semantics=("arbitrary", "arbitrary")),
    )(x, t)
    return out[0, 0]


def _reference(inputs, targets):
    x = inputs.astype(jnp.float32) + 1e-8
    probs = jax.nn.softmax(x, axis=1)
    return jnp.mean(-jnp.sum(jnp.log(probs + 1e-8) * targets, axis=1))


if __name__ == "__main__":
    key = jax.random.PRNGKey(0)
    k1, k2 = jax.random.split(key)

    # Small NCHW shapes: batch=2, channels=4, spatial=16x16.
    shape = (2, 4, 16, 16)
    inputs = jax.random.normal(k1, shape, dtype=jnp.float32)
    labels = jax.random.randint(k2, (shape[0], shape[2], shape[3]), 0, shape[1])
    targets = jax.nn.one_hot(labels, shape[1], axis=1, dtype=jnp.float32)

    loss = softmax_ranking_loss(inputs, targets)
    jax.block_until_ready(loss)

    ref = _reference(inputs, targets)
    assert jnp.allclose(loss, ref, rtol=1e-5, atol=1e-5), (loss, ref)
    print("KERNEL_OK")
</pallas_src>

<mosaic_0001>
module attributes {stable_mosaic.version = 11 : i64} {
  func.func @_softmax_ranking_loss_kernel(%arg0: i32, %arg1: i32, %arg2: memref<1x4x256xf32, #tpu.memory_space<vmem>>, %arg3: memref<1x4x256xf32, #tpu.memory_space<vmem>>, %arg4: memref<1x1xf32, #tpu.memory_space<smem>>, %arg5: memref<1x256xf32, #tpu.memory_space<vmem>>) attributes {dimension_semantics = [#tpu.dimension_semantics<arbitrary>, #tpu.dimension_semantics<arbitrary>], iteration_bounds = array<i64: 2, 1>, scalar_prefetch = 0 : i64, scratch_operands = 1 : i64, tpu.core_type = #tpu.core_type<tc>, window_params = [{transform_indices = @transform_0, window_bounds = array<i64: 1, 4, 256>}, {transform_indices = @transform_1, window_bounds = array<i64: 1, 4, 256>}, {transform_indices = @transform_2, window_bounds = array<i64: 1, 1>}]} {
    %c0_i32 = arith.constant 0 : i32
    %0 = arith.cmpi eq, %arg0, %c0_i32 : i32
    %c0_i32_0 = arith.constant 0 : i32
    %1 = arith.cmpi eq, %arg1, %c0_i32_0 : i32
    %2 = arith.andi %0, %1 : i1
    %3 = arith.extui %2 : i1 to i32
    %c0_i32_1 = arith.constant 0 : i32
    %4 = arith.cmpi ne, %3, %c0_i32_1 : i32
    scf.if %4 {
      %cst_16 = arith.constant 0.000000e+00 : f32
      %32 = vector.broadcast %cst_16 : f32 to vector<1x256xf32>
      %c0_17 = arith.constant 0 : index
      %c0_18 = arith.constant 0 : index
      %33 = vector.load %arg5[%c0_17, %c0_18] : memref<1x256xf32, #tpu.memory_space<vmem>>, vector<1x256xf32>
      tpu.vector_store %arg5[%c0_17, %c0_18], %32 {strides = array<i32>} : memref<1x256xf32, #tpu.memory_space<vmem>>, vector<1x256xf32>,
    } else {
    }
    %c0 = arith.constant 0 : index
    %c0_2 = arith.constant 0 : index
    %c0_3 = arith.constant 0 : index
    %5 = vector.load %arg2[%c0, %c0_2, %c0_3] : memref<1x4x256xf32, #tpu.memory_space<vmem>>, vector<1x4x256xf32>
    %6 = vector.shape_cast %5 : vector<1x4x256xf32> to vector<4x256xf32>
    %c0_4 = arith.constant 0 : index
    %c0_5 = arith.constant 0 : index
    %c0_6 = arith.constant 0 : index
    %7 = vector.load %arg3[%c0_4, %c0_5, %c0_6] : memref<1x4x256xf32, #tpu.memory_space<vmem>>, vector<1x4x256xf32>
    %8 = vector.shape_cast %7 : vector<1x4x256xf32> to vector<4x256xf32>
    %cst = arith.constant dense<0xFF800000> : vector<256xf32>
    %9 = vector.multi_reduction <maximumf>, %6, %cst [0] : vector<4x256xf32> to vector<256xf32>
    %10 = vector.shape_cast %9 : vector<256xf32> to vector<1x256xf32>
    %11 = vector.broadcast %10 : vector<1x256xf32> to vector<4x256xf32>
    %12 = arith.subf %6, %11 : vector<4x256xf32>
    %13 = math.exp %12 : vector<4x256xf32>
    %cst_7 = arith.constant dense<0.000000e+00> : vector<256xf32>
    %14 = vector.multi_reduction <add>, %13, %cst_7 [0] : vector<4x256xf32> to vector<256xf32>
    %15 = vector.shape_cast %14 : vector<256xf32> to vector<1x256xf32>
    %16 = math.log %15 : vector<1x256xf32>
    %17 = vector.broadcast %16 : vector<1x256xf32> to vector<4x256xf32>
    %18 = arith.subf %12, %17 : vector<4x256xf32>
    %c0_8 = arith.constant 0 : index
    %c0_9 = arith.constant 0 : index
    %19 = vector.load %arg5[%c0_8, %c0_9] : memref<1x256xf32, #tpu.memory_space<vmem>>, vector<1x256xf32>
    %20 = arith.mulf %18, %8 : vector<4x256xf32>
    %cst_10 = arith.constant dense<0.000000e+00> : vector<256xf32>
    %21 = vector.multi_reduction <add>, %20, %cst_10 [0] : vector<4x256xf32> to vector<256xf32>
    %22 = vector.shape_cast %21 : vector<256xf32> to vector<1x256xf32>
    %cst_11 = arith.constant 0.000000e+00 : f32
    %23 = vector.broadcast %cst_11 : f32 to vector<1x256xf32>
    %24 = arith.subf %23, %22 : vector<1x256xf32>
    %25 = arith.addf %19, %24 : vector<1x256xf32>
    %c0_12 = arith.constant 0 : index
    %c0_13 = arith.constant 0 : index
    %26 = vector.load %arg5[%c0_12, %c0_13] : memref<1x256xf32, #tpu.memory_space<vmem>>, vector<1x256xf32>
    tpu.vector_store %arg5[%c0_12, %c0_13], %25 {strides = array<i32>} : memref<1x256xf32, #tpu.memory_space<vmem>>, vector<1x256xf32>,
    %c1_i32 = arith.constant 1 : i32
    %27 = arith.cmpi eq, %arg0, %c1_i32 : i32
    %c0_i32_14 = arith.constant 0 : i32
    %28 = arith.cmpi eq, %arg1, %c0_i32_14 : i32
    %29 = arith.andi %27, %28 : i1
    %30 = arith.extui %29 : i1 to i32
    %c0_i32_15 = arith.constant 0 : i32
    %31 = arith.cmpi ne, %30, %c0_i32_15 : i32
    scf.if %31 {
      %c0_16 = arith.constant 0 : index
      %c0_17 = arith.constant 0 : index
      %32 = vector.load %arg5[%c0_16, %c0_17] : memref<1x256xf32, #tpu.memory_space<vmem>>, vector<1x256xf32>
      %33 = vector.shape_cast %32 : vector<1x256xf32> to vector<1x1x256xf32>
      %cst_18 = arith.constant dense<0.000000e+00> : vector<1xf32>
      %34 = vector.multi_reduction <add>, %33, %cst_18 [1, 2] : vector<1x1x256xf32> to vector<1xf32>
      %35 = vector.shape_cast %34 : vector<1xf32> to vector<1x1x1xf32>
      %36 = vector.extract %35[0, 0, 0] : f32 from vector<1x1x1xf32>
      %cst_19 = arith.constant 0.001953125 : f32
      %37 = arith.mulf %36, %cst_19 : f32
      %c0_20 = arith.constant 0 : index
      %c0_21 = arith.constant 0 : index
      %38 = memref.load %arg4[%c0_20, %c0_21] : memref<1x1xf32, #tpu.memory_space<smem>>
      memref.store %37, %arg4[%c0_20, %c0_21] : memref<1x1xf32, #tpu.memory_space<smem>>
    } else {
    }
    return
  }
  func.func @transform_0(%arg0: i32, %arg1: i32) -> (i32, i32, i32) {
    %c0_i32 = arith.constant 0 : i32
    %c0_i32_0 = arith.constant 0 : i32
    return %arg0, %c0_i32, %arg1 : i32, i32, i32
  }
  func.func @transform_1(%arg0: i32, %arg1: i32) -> (i32, i32, i32) {
    %c0_i32 = arith.constant 0 : i32
    %c0_i32_0 = arith.constant 0 : i32
    return %arg0, %c0_i32, %arg1 : i32, i32, i32
  }
  func.func @transform_2(%arg0: i32, %arg1: i32) -> (i32, i32) {
    %c0_i32 = arith.constant 0 : i32
    %c0_i32_0 = arith.constant 0 : i32
    %c0_i32_1 = arith.constant 0 : i32
    return %c0_i32, %c0_i32_0 : i32, i32
  }
}

</mosaic_0001>

<bundles_post_ra>
// kernel: tpu_custom_call.1
= control target key start
LH: loop header
LB: loop body
LE: loop exit
PB: predicated region body
PF: predicated region fallthrough
CT: control target
= control target key end

     0   :  { %7 = vsyncpa [#allocation4], 0  ;;  %s831_s0 = inlined_call_operand.hbm [shape: f32[2,4,256], index: 0, kind: input, shape index: {}]   ;;  %s832_s1 = inlined_call_operand.hbm [shape: f32[2,4,256], index: 1, kind: input, shape index: {}]   ;;  %s833_s2 = inlined_call_operand.hbm [shape: f32[1,1], index: 2, kind: output, shape index: {}]  }
   0x1   :  { %9 = vsyncpa [#allocation4 + $0x1], 0 }
   0x2   :  { %10 = vsyncpa [#allocation7], 0 }
   0x3   :  { %12 = vsyncpa [#allocation7 + $0x1], 0 }
   0x4   :  { %13 = vsyncpa [#allocation5], 0  ;;  %s690_s9 = smov 0   ;;  %s692_s10 = smov 0  }
   0x5   :  { %s694_s11 = smov 0   ;;  %s696_s12 = smov 0  }
   0x6   :  { %s698_s13 = smov 0   ;;  %s700_s14 = smov 0  }
   0x7 LB: > { %s444_s15 = sadd.s32 4294967295, %s668_s14   ;;  %s31_s16 = sadd.s32 1, %s664_s13  ;;  %s668_s14 = sphi %s700_s14, %s19_s14   ;;  %s664_s13 = sphi %s698_s13, %s842_s13   ;;  %s660_s12 = sphi %s696_s12, %s841_s12   ;;  %s656_s11 = sphi %s694_s11, %s840_s11   ;;  %s652_s10 = sphi %s692_s10, %s839_s10   ;;  %s648_s9 = sphi %s690_s9, %s838_s9  }
   0x8   : > { %p33_p0 = scmp.ge.s32.totalorder %s31_s16, 2  ;;  %s40_s17 = sadd.s32 1, %s656_s11 }
   0x9   : > { %p47_p1 = scmp.ne.s32.totalorder %s656_s11, %s652_s10  ;;  %p48_p2 = scmp.eq.s32.totalorder %s668_s14, 0 }
   0xa   : > { %s844_s16 = smov (%p33_p0, %s31_s16), 0  ;;  %p53_p4 = scmp.ne.s32.totalorder %s652_s10, %s648_s9 }
   0xb   : > { %p726_p3 = por %p48_p2, %p47_p1  ;;  %s35_s19 = ssub.s32 %s664_s13, %s844_s16 }
   0xc   : > { %p54_p5 = scmp.eq.s32.totalorder %s444_s15, 0  ;;  %p38_p6 = scmp.eq.s32.totalorder %s35_s19, 0 }
   0xd   : > { %p483_p8 = scmp.lt.s32.totalorder %s668_s14, 2  ;;  %s744_s22 = sand.u32 1, %s656_s11  }
   0xe   : > { %p735_p7 = por %p54_p5, %p53_p4  ;;  %s462_s23 = sshll.u32 %s664_s13, 7 }
   0xf   : > { %s741_s21 = scalar_select %p38_p6, %s656_s11, %s40_s17  }
  0x10   : > { %s447_s24 = sshll.u32 %s744_s22, 3  ;;  %s138_s27 = scalar_lea.hbm %s831_s0, %s462_s23 }
  0x11   : > { %s130_s28 = scalar_lea.vmem [#allocation3], %s447_s24  ;;  %p753_p9 = pnand %p483_p8, %p726_p3 }
  0x12   : > { %s140_s29 = sshll.u32 %s130_s28, 4  ;;  %p453_p10 = scmp.ge.s32.totalorder %s668_s14, 1  ;;  %s141_s29 = int_to_ptr.vmem [resolvable:$true] %s140_s29 }
  0x13   : > { %p166_p11 = scmp.lt.s32.totalorder %s668_s14, 3  ;;  %s127_s3 = scalar_lea.sflag [#allocation4], %s744_s22 }
  0x14   : > { %p546_p12 = pneg %p753_p9  ;;  %s557_s4 = scalar_lea.vmem %s141_s29, 128 }
  0x15   : > { %p558_p13 = scmp.ne.s32.totalorder %s141_s29, %s557_s4  ;;  %s670_s5 = smov [#allocation3]  }
  0x16   : > { %s562_s6 = sshll.u32 %s670_s5, 4  ;;  %s563_s6 = int_to_ptr.vmem [resolvable:$false] %s562_s6 }
  0x17   : > { %p560_p0 = pnand %p558_p13, %p546_p12  ;;  %s564_s7 = scalar_lea.vmem %s563_s6, 256 }
  0x18   : > { %p565_p2 = scmp.lt.s32.totalorder %s141_s29, %s563_s6  ;;  %p566_p3 = scmp.lt.s32.totalorder %s564_s7, %s557_s4 }
  0x19   : > { %p561_p1 = pneg %p560_p0 }
  0x1a   : > { %p567_p4 = por %p566_p3, %p565_p2 }
  0x1c   : > { %p568_p5 = pnand %p567_p4, %p561_p1 }
  0x1e   : > { %571 = shalt.err (!%p568_p5)
}
  0x1f   : > { %479 = dma.hbm_to_vmem [thread:$0]  (!%p753_p9), %s138_s27, 128, %s141_s29, %s127_s3  }
  0x20   : > { %p771_p6 = pnand %p453_p10, %p166_p11  ;;  %s159_s18 = scalar_lea.hbm %s832_s1, %s462_s23 }
  0x21   : > { %s151_s19 = scalar_lea.vmem [#allocation6], %s447_s24  ;;  %s148_s26 = scalar_lea.sflag [#allocation7], %s744_s22 }
  0x22   : > { %s161_s25 = sshll.u32 %s151_s19, 4  ;;  %s671_s27 = smov [#allocation6]   ;;  %s162_s25 = int_to_ptr.vmem [resolvable:$true] %s161_s25 }
  0x23   : > { %s585_s28 = scalar_lea.vmem %s162_s25, 128  ;;  %s590_s29 = sshll.u32 %s671_s27, 4  ;;  %s591_s29 = int_to_ptr.vmem [resolvable:$false] %s590_s29 }
  0x24   : > { %p586_p8 = scmp.ne.s32.totalorder %s162_s25, %s585_s28  ;;  %s592_s3 = scalar_lea.vmem %s591_s29, 256 }
  0x25   : > { %p593_p10 = scmp.lt.s32.totalorder %s162_s25, %s591_s29  ;;  %p594_p11 = scmp.lt.s32.totalorder %s592_s3, %s585_s28 }
  0x26   : > { %p588_p13 = pnand %p586_p8, %p546_p12 }
  0x27   : > { %p595_p1 = por %p594_p11, %p593_p10 }
  0x28   : > { %p589_p0 = pneg %p588_p13 }
  0x2a   : > { %p596_p2 = pnand %p595_p1, %p589_p0 }
  0x2c   : > { %599 = shalt.err (!%p596_p2)
}
  0x2d   : > { %482 = dma.hbm_to_vmem [thread:$0]  (!%p753_p9), %s159_s18, 128, %s162_s25, %s148_s26  }
  0x2e   : > { %170 = sbr.rel (%p771_p6) target bundleno = 381 (0x17d), region = 28  ;;  %s172_s22 = sand.u32 (!%p771_p6), 1, %s652_s10  }
  0x2f   : > { %s454_s23 = sshll.u32 (!%p771_p6), %s172_s22, 3  ;;  %s173_s24 = scalar_lea.sflag (!%p771_p6), [#allocation4], %s172_s22 }
  0x30   : > { %s176_s4 = scalar_lea.vmem (!%p771_p6), [#allocation3], %s454_s23 }
  0x33   : > { %635 = dma.done.wait (%p735_p7), %s173_s24, 128  }
  0x34   : > { %637 = vsyncadd (%p735_p7), %s173_s24, 4294967168  ;;  %s182_s5 = scalar_lea.sflag [#allocation7], %s172_s22  ;;  %s791_s6 = scalar_lea.vmem [#allocation6], %s454_s23 }
  0x35   : > { %639 = dma.done.wait (%p735_p7), %s182_s5, 128  }
  0x36   : > { %641 = vsyncadd (%p735_p7), %s182_s5, 4294967168  ;;  %p208_p9 = scmp.eq.s32.totalorder %s660_s12, 0 }
  0x37   : > { %v214_v0 = vlaneseq (%p208_p9)  ;;  %v672_v1 = vmov (%p208_p9), 0.0  }
  0x38   : > { %213 = sbr.rel (!%p208_p9) target bundleno = 61 (0x3d), region = 40 }
  0x39   : > { %vm216_vm0 = vcmp.lt.s32.totalorder (%p208_p9), %v214_v0, 256 }
  0x3a   : > { %218 = vst.msk [vmem:[#allocation2] sm:$0x3] (%p208_p9), %vm216_vm0, %v672_v1 }
  0x3d PF: > { %v219_v2 = vld [vmem:[%s176_s4] sm:$0xff]  ;;  %vm224_vm1 = vcmask 1043456   ;;  %p317_p12 = scmp.eq.s32.totalorder %s660_s12, 1  ;;  %v220_v42 = vld [vmem:[%s791_s6] sm:$0xff]  ;;  %v673_v55 = vmov 1966171168   ;;  %v299_v57 = vlaneseq }
  0x3e   : > { %v222_v3 = vcombine.high %v219_v2, %v219_v2  ;;  %v225_v4 = vsel %vm224_vm1, %v219_v2, -inf  ;;  %v297_v56 = vunpack.c.l.s4 %v673_v55  ;;  %vm334_vm3 = vcmask (%p317_p12), 1040384  }
  0x3f   : > { %v226_v5 = vrot.slane %v225_v4, 4  ;;  %v300_v63 = vshrl.u32 %v299_v57, 7  ;;  %vm314_vm2 = vcmp.lt.s32.totalorder %v299_v57, 256 }
  0x40   : > { %v232_v6 = vsel %vm224_vm1, %v222_v3, -inf  ;;  %v298_v62 = vunpack.c.0.s8 %v297_v56 }
  0x41   : > { %v227_v7 = vmax.f32 %v225_v4, %v226_v5  ;;  %v233_v8 = vrot.slane %v232_v6, 4 }
  0x42   : > { %v301_v3 = vsub.s32 %v298_v62, %v300_v63 }
  0x43   : > { %v228_v9 = vrot.slane %v227_v7, 2  ;;  %v234_v10 = vmax.f32 %v232_v6, %v233_v8  ;;  %v272_v6 = vld [vmem:[#allocation2] sm:$0x3] }
  0x45   : > { %v229_v11 = vmax.f32 %v227_v7, %v228_v9  ;;  %v235_v12 = vrot.slane %v234_v10, 2 }
  0x47   : > { %v230_v13 = vrot.slane %v229_v11, 1  ;;  %v236_v14 = vmax.f32 %v234_v10, %v235_v12  ;;  %v326_v10 = vsub.s32 (%p317_p12), 0, %v300_v63 }
  0x49   : > { %v231_v15 = vmax.f32 %v229_v11, %v230_v13  ;;  %v237_v16 = vrot.slane %v236_v14, 1  ;;  %v330_v11 = vsub.s32 (%p317_p12), 1, %v300_v63 }
  0x4b   : > { %v238_v17 = vmax.f32 %v236_v14, %v237_v16 }
  0x4d   : > { %v241_v18 = vcombine.low %v231_v15, %v238_v17 }
  0x4f   : > { %v243_v19 = vsub.f32 %v219_v2, %v241_v18 }
  0x51   : > { %v244_v20 = vmul.f32 1.442695, %v243_v19 }
  0x53   : > { %538 = vpow2.f32 %v244_v20 }
  0x60   : > { %v539_v21 = vpop.eup %538 }
  0x61   : > { %v247_v22 = vcombine.high %v539_v21, %v539_v21  ;;  %v249_v23 = vsel %vm224_vm1, %v539_v21, 0.0 }
  0x62   : > { %v250_v24 = vrot.slane %v249_v23, 4 }
  0x63   : > { %v256_v25 = vsel %vm224_vm1, %v247_v22, 0.0 }
  0x64   : > { %v251_v26 = vadd.f32 %v250_v24, %v249_v23  ;;  %v257_v27 = vrot.slane %v256_v25, 4 }
  0x66   : > { %v252_v28 = vrot.slane %v251_v26, 2  ;;  %v258_v29 = vadd.f32 %v257_v27, %v256_v25 }
  0x68   : > { %v253_v30 = vadd.f32 %v252_v28, %v251_v26  ;;  %v259_v31 = vrot.slane %v258_v29, 2 }
  0x6a   : > { %v254_v32 = vrot.slane %v253_v30, 1  ;;  %v260_v33 = vadd.f32 %v259_v31, %v258_v29 }
  0x6c   : > { %v255_v34 = vadd.f32 %v254_v32, %v253_v30  ;;  %v261_v35 = vrot.slane %v260_v33, 1 }
  0x6e   : > { %v262_v36 = vadd.f32 %v261_v35, %v260_v33  ;;  %540 = vlog2.f32 %v255_v34 }
  0x70   : > { %542 = vlog2.f32 %v262_v36 }
  0x7b   : > { %v541_v37 = vpop.eup %540 }
  0x7c   : > { %v264_v38 = vmul.f32 0.6931472, %v541_v37 }
  0x7d   : > { %v543_v39 = vpop.eup %542 }
  0x7e   : > { %v266_v40 = vmul.f32 0.6931472, %v543_v39 }
  0x80   : > { %v269_v41 = vcombine.low %v264_v38, %v266_v40 }
  0x82   : > { %v271_v43 = vsub.f32 %v243_v19, %v269_v41 }
  0x84   : > { %v273_v44 = vmul.f32 %v271_v43, %v220_v42 }
  0x86   : > { %v275_v45 = vcombine.high %v273_v44, %v273_v44  ;;  %v277_v46 = vsel %vm224_vm1, %v273_v44, 0.0 }
  0x87   : > { %v278_v47 = vrot.slane %v277_v46, 4 }
  0x88   : > { %v284_v48 = vsel %vm224_vm1, %v275_v45, 0.0 }
  0x89   : > { %v279_v49 = vadd.f32 %v278_v47, %v277_v46  ;;  %v285_v50 = vrot.slane %v284_v48, 4 }
  0x8b   : > { %v280_v51 = vrot.slane %v279_v49, 2  ;;  %v286_v52 = vadd.f32 %v285_v50, %v284_v48 }
  0x8d   : > { %v281_v53 = vadd.f32 %v280_v51, %v279_v49  ;;  %v287_v54 = vrot.slane %v286_v52, 2 }
  0x8f   : > { %v282_v58 = vrot.slane %v281_v53, 1  ;;  %v288_v59 = vadd.f32 %v287_v54, %v286_v52 }
  0x91   : > { %v283_v60 = vadd.f32 %v282_v58, %v281_v53  ;;  %v289_v61 = vrot.slane %v288_v59, 1 }
  0x93   : > { %v290_v0 = vadd.f32 %v289_v61, %v288_v59  ;;  %v291_v1 = vsub.f32 0.0, %v283_v60 }
  0x95   : > { %v292_v2 = vsub.f32 0.0, %v290_v0 }
  0x97   : > { %v295_v4 = vcombine.low %v291_v1, %v292_v2 }
  0x99   : > { %v302_v5 = vrot.slane %v295_v4, %v301_v3 }
  0x9b   : > { %v309_v7 = vrot.slane %v302_v5, %v301_v3  ;;  %321 = sbr.rel (!%p317_p12) target bundleno = 375 (0x177), region = 44 }
  0x9d   : > { %v311_v8 = vadd.f32 %v309_v7, %v272_v6 }
  0x9f   : > { %316 = vst.msk [vmem:[#allocation2] sm:$0x3] %vm314_vm2, %v311_v8 }
  0xa6   : > { %v322_v9 = vld [vmem:[#allocation2] sm:$0x3] }
  0xa7   : > { %v327_v12 = vrot.slane %v322_v9, %v326_v10  ;;  %v331_v13 = vrot.slane %v322_v9, %v330_v11 }
  0xa9   : > { %v335_v14 = vsel %vm334_vm3, %v327_v12, 0.0  ;;  %v336_v15 = vsel %vm334_vm3, %v331_v13, 0.0 }
  0xaa   : > { %v337_v16 = vadd.f32 %v336_v15, %v335_v14 }
  0xac   : > { %338 = vadd.xlane.f32.xlu0 %v337_v16 }
 0x135   : > { %v339_v17 = vpop.xlane.xlu0 %338 }
 0x136   : > { %v340_v18 = vrot.slane %v339_v17, 4 }
 0x138   : > { %v341_v19 = vadd.f32 %v340_v18, %v339_v17 }
 0x13a   : > { %v342_v20 = vrot.slane %v341_v19, 2 }
 0x13c   : > { %v343_v21 = vadd.f32 %v342_v20, %v341_v19 }
 0x13e   : > { %v344_v22 = vrot.slane %v343_v21, 1 }
 0x140   : > { %v345_v23 = vadd.f32 %v344_v22, %v343_v21 }
 0x142   : > { %466 = vpush %v345_v23 }
 0x173   : > { %s467_s12 = spop %466 }
 0x174   : > { %s347_s20 = smul.f32 0.001953125, %s467_s12 }
 0x176   : > { %349 = sst [smem:[#allocation8]] %s347_s20 }
 0x177 PF: > { %p484_p7 = scmp.eq.s32.totalorder %s444_s15, 1  ;;  %s674_s30 = smov [#allocation8]  }
 0x179   : > { %473 = dma.smem_to_hbm (%p484_p7), %s674_s30, 16, %s833_s2, [#allocation5]  }
 0x17a   : > { %643 = dma.done.wait (%p484_p7), [#allocation5], 16  }
 0x17b   : > { %645 = vsyncadd (%p484_p7), [#allocation5], 4294967280 }
 0x17c   : > { %363 = sfence }
 0x17d PF: > { %s19_s14 = sadd.s32 1, %s668_s14   ;;  %s838_s9 = smov %s652_s10 }
 0x17e   : > { %p16_p3 = scmp.ge.s32.totalorder %s19_s14, 4   ;;  %s839_s10 = smov %s656_s11 }
 0x17f   : > { %s840_s11 = smov %s741_s21  ;;  %s841_s12 = smov %s664_s13 }
 0x180   : > { %s842_s13 = smov %s844_s16  ;;  %18 = sbr.rel (!%p16_p3) target bundleno = 7 (0x7), region = 87 }
 0x185   :  { %369 = vsyncpa [#allocation4], 1 }
 0x186   :  { %371 = vsyncpa [#allocation4 + $0x1], 1 }
 0x187   :  { %372 = vsyncpa [#allocation7], 1 }
 0x188   :  { %374 = vsyncpa [#allocation7 + $0x1], 1 }
 0x189   :  { %375 = vsyncpa [#allocation5], 1 }
 0x18a   :  { %377 = vsyncpa [#allocation5 + $0x1], 1 }

</bundles_post_ra>
